<compile_context>
chip_gen: v6e
topology: v6e:2x2x1
jax: 0.10.0
libtpu: 0.0.40
codegen_flags: <defaults>
</compile_context>

<pallas_src>
import functools

import jax
import jax.numpy as jnp
import numpy as np
from jax import lax
from jax.experimental import pallas as pl
from jax.experimental.pallas import tpu as pltpu

NOUT = 16            # nout in the torch module
NIN = 3 * NOUT       # 48 (concat of [fc, spectconv, gated] branches)
NLAYERS = 4
HID = 32             # fc1 width


# ----------------------------------------------------------------------------- budgets

def _usable_vmem_bytes():
    """Generation-aware VMEM budget: ~112 MiB on v5e/v6e (128 MiB), ~56 MiB on v7x (64 MiB)."""
    try:
        cap = int(pltpu.get_tpu_info().vmem_capacity_bytes)
    except Exception:
        cap = 64 << 20                       # conservative fallback (v7x size)
    return (cap * 7) // 8


def _fused_vmem_need(n_pad, g, adj_itemsize, w_itemsize):
    return (n_pad * n_pad * adj_itemsize             # adj VMEM scratch
            + 6 * n_pad * NIN * 4                    # h / pre / branch temporaries (f32)
            + g * n_pad * adj_itemsize               # pool
            + NLAYERS * NIN * 4 * NOUT * w_itemsize  # fused layer weights
            + (4 << 20))                             # fixed headroom


def _tiled_vmem_need(row_tile, n_pad, adj_itemsize, adj_resident):
    adj_bytes = (2 * n_pad * n_pad * adj_itemsize if adj_resident   # conservative 2 bufs
                 else 2 * row_tile * n_pad * adj_itemsize)          # double-buffered tile
    return (adj_bytes
            + 2 * n_pad * NOUT * adj_itemsize        # xv (constant block)
            + 4 * row_tile * NIN * 4                 # ht / out double-buffered
            + 8 * row_tile * NOUT * 4                # pre & branch temporaries
            + (4 << 20))


def _pick_row_tile(n_ref, adj_itemsize, usable):
    """Largest multiple-of-8 tile in [8, 512] whose double-buffered adj tile fits."""
    resident = 2 * n_ref * NOUT * adj_itemsize + (8 << 20)
    per_row = 2 * n_ref * adj_itemsize + 4 * NIN * 4 + 8 * NOUT * 4
    t = (usable - resident) // max(per_row, 1)
    t = int(max(8, min(512, (t // 8) * 8)))
    return min(t, ((n_ref + 7) // 8) * 8)


# ----------------------------------------------------------------------------- kernels

def _head(h, pool, f1w, f1b, f2wt, f2b):
    """global_add_pool -> fc1 -> relu -> fc2, producing lane-dense [1, G] logits.

    Pooling is done FIRST (pool @ h, G << N) so fc1 is only a [G,48]x[48,32] matmul."""
    f32 = jnp.float32
    pooled = jnp.dot(pool, h.astype(pool.dtype), preferred_element_type=f32)      # [G, 48]
    hid = jnp.maximum(jnp.dot(pooled, f1w, preferred_element_type=f32) + f1b, 0.0)
    # logits [1, G] = f2w^T (1x32) contracted with hid (Gx32) over the 32-dim axis
    return lax.dot_general(f2wt, hid, (((1,), (1,)), ((), ())),
                           preferred_element_type=f32) + f2b


def gnnml1_fused_kernel(x_ref, adj_hbm_ref, pool_ref, wf_ref, bf_ref, bv_ref,
                        f1w_ref, f1b_ref, f2wt_ref, f2b_ref, out_ref,
                        adj_vmem, adj_sem):
    """All-resident fused forward: 4 layers + pooling head in one gridless kernel.

    adj stays in HBM (memory_space=pl.ANY); its DMA into adj_vmem is started at kernel
    entry and waited on only right before the first adj matmul, hiding the O(N^2) copy
    behind layer-0's dense work.

    wf: [4, 48, 64] = per-layer [Wa | Wv | Wb | Wc] (bf16 when use_bf16);
    bf: [4, 1, 64] f32 fused bias with a ZERO slot for the SpectConv branch;
    bv: [4, 1, 16] f32 SpectConv bias (added after the adj matmul)."""
    f32 = jnp.float32
    cdt = wf_ref.dtype
    cp = pltpu.make_async_copy(adj_hbm_ref, adj_vmem, adj_sem)
    cp.start()

    h = x_ref[...]                                        # [N, 48] f32
    adj = None
    for l in range(NLAYERS):
        pre = jnp.dot(h.astype(cdt), wf_ref[l], preferred_element_type=f32) + bf_ref[l]
        a = jnp.maximum(pre[:, 0 * NOUT:1 * NOUT], 0.0)   # relu(fcX1)
        xv = pre[:, 1 * NOUT:2 * NOUT]                    # h @ Wv (SpectConv, pre-bias)
        m = jnp.maximum(pre[:, 2 * NOUT:3 * NOUT] * pre[:, 3 * NOUT:4 * NOUT], 0.0)
        if l == 0:
            cp.wait()                                     # adj DMA overlapped up to here
            adj = adj_vmem[...]
        v = jnp.maximum(
            jnp.dot(adj, xv.astype(adj.dtype), preferred_element_type=f32) + bv_ref[l],
            0.0)                                          # relu(SpectConv)
        h = jnp.concatenate([a, v, m], axis=1)            # [N, 48] f32
    out_ref[...] = _head(h, pool_ref[...], f1w_ref[...], f1b_ref[...],
                         f2wt_ref[...], f2b_ref[...])


def gnnml1_xv_kernel(h_ref, wv_ref, out_ref):
    """xv = h @ Wv computed ONCE per layer (hoisted out of the row-tiled layer kernel)."""
    xv = jnp.dot(h_ref[...].astype(wv_ref.dtype), wv_ref[...],
                 preferred_element_type=jnp.float32)
    out_ref[...] = xv.astype(out_ref.dtype)


def gnnml1_layer_kernel(ht_ref, adj_ref, xv_ref, wabc_ref, babc_ref, bv_ref, out_ref,
                        *, row_tile, adj_resident):
    """One GNNML1 layer for one destination-row tile (row-tiled path).

    ht  : [T, 48]  this tile's rows of the previous hidden state (f32)
    adj : [T, N] streamed OR [N, N] resident adjacency (bf16/f32; exact 0/1 values)
    xv  : [N, 16]  precomputed h @ Wv for the whole graph (adj dtype)
    wabc/babc : fused fc?1|fc?2|fc?3 weights [48,48] / [1,48];  bv: SpectConv bias [1,16]
    """
    f32 = jnp.float32
    pre = jnp.dot(ht_ref[...].astype(wabc_ref.dtype), wabc_ref[...],
                  preferred_element_type=f32) + babc_ref[...]                 # [T, 48]
    a = jnp.maximum(pre[:, 0 * NOUT:1 * NOUT], 0.0)
    m = jnp.maximum(pre[:, 1 * NOUT:2 * NOUT] * pre[:, 2 * NOUT:3 * NOUT], 0.0)
    if adj_resident:
        start = pl.multiple_of(pl.program_id(0) * row_tile, row_tile)
        adj = adj_ref[pl.ds(start, row_tile), :]
    else:
        adj = adj_ref[...]
    v = jnp.maximum(
        jnp.dot(adj, xv_ref[...], preferred_element_type=f32) + bv_ref[...], 0.0)
    out_ref[...] = jnp.concatenate([a, v, m], axis=1)                          # [T, 48]


def gnnml1_head_kernel(h_ref, pool_ref, f1w_ref, f1b_ref, f2wt_ref, f2b_ref, out_ref):
    out_ref[...] = _head(h_ref[...], pool_ref[...], f1w_ref[...], f1b_ref[...],
                         f2wt_ref[...], f2b_ref[...])


# ----------------------------------------------------------------------------- wrapper

def gnnml1_forward(x, adj, pool, params, *, use_bf16=True, row_tile=None, stream_adj=None):
    """GNNML1 forward (concat variant).

    use_bf16   : adj/pool/layer weights and MXU operands in bf16 (0/1 matrices are exact),
                 f32 accumulation + f32 elementwise math.  Default on.
    row_tile   : None -> auto: single all-resident fused kernel if it fits the
                 generation's VMEM budget, else row-tiled per-layer kernels with an
                 auto-sized tile (up to 512 rows).  int (multiple of 8) -> force tiled.
    stream_adj : tiled path only.  True -> stream adj one (row_tile, N) block per grid
                 step (large graphs).  False -> full adj resident in VMEM with a constant
                 index_map (medium graphs; both v7x TensorCores, no adj HBM re-read).
                 None -> auto.
    """
    N, F = x.shape
    G = pool.shape[0]
    assert F <= NIN
    cdt = jnp.bfloat16 if use_bf16 else jnp.float32          # MXU operand dtype
    adj_dt = cdt
    adj_is = jnp.dtype(adj_dt).itemsize
    usable = _usable_vmem_bytes()
    n8 = ((N + 7) // 8) * 8

    use_fused = (row_tile is None and
                 _fused_vmem_need(n8, G, adj_is, jnp.dtype(cdt).itemsize) <= usable)

    if use_fused:
        n_pad = n8
    else:
        if row_tile is None:
            row_tile = _pick_row_tile(n8, adj_is, usable)
        assert row_tile % 8 == 0, "row_tile must be a multiple of 8 (sublane)"
        n_pad = ((N + row_tile - 1) // row_tile) * row_tile
        if stream_adj is None:
            stream_adj = _tiled_vmem_need(row_tile, n_pad, adj_is, True) > usable

    # zero-padding is exact: padded feature columns meet zero weight rows, padded nodes
    # have zero adj columns and zero pool columns.
    x_pad = jnp.zeros((n_pad, NIN), jnp.float32).at[:N, :F].set(x)
    adj_p = jnp.zeros((n_pad, n_pad), jnp.float32).at[:N, :N].set(adj).astype(adj_dt)
    pool_p = jnp.zeros((G, n_pad), jnp.float32).at[:, :N].set(pool).astype(adj_dt)

    layers = params["layers"]

    def pad_rows(w):  # pad layer-1 weights from F rows to 48 rows (exact, zeros)
        return jnp.zeros((NIN, w.shape[1]), jnp.float32).at[:w.shape[0], :].set(w)

    f1w = params["f1w"]                          # [48, 32]
    f1b = params["f1b"].reshape(1, HID)
    f2wt = params["f2w"].T                       # [1, 32]  (lane-dense head)
    f2b = params["f2b"].reshape(1, 1)

    vmem = pl.BlockSpec(memory_space=pltpu.MemorySpace.VMEM)

    if use_fused:
        # ---------------- all-resident fused kernel ----------------
        wf = jnp.stack([jnp.concatenate([pad_rows(p["wa"]), pad_rows(p["wv"]),
                                         pad_rows(p["wb"]), pad_rows(p["wc"])], axis=1)
                        for p in layers], axis=0).astype(cdt)                     # [4,48,64]
        bf = jnp.stack([jnp.concatenate([p["ba"], jnp.zeros((NOUT,), jnp.float32),
                                         p["bb"], p["bc"]]).reshape(1, 4 * NOUT)
                        for p in layers], axis=0)                                 # [4,1,64]
        bv = jnp.stack([p["bv"].reshape(1, NOUT) for p in layers], axis=0)        # [4,1,16]

        inputs = (x_pad, adj_p, pool_p, wf, bf, bv, f1w, f1b, f2wt, f2b)
        out = pl.pallas_call(
            gnnml1_fused_kernel,
            out_shape=jax.ShapeDtypeStruct((1, G), jnp.float32),
            in_specs=[vmem, pl.BlockSpec(memory_space=pl.ANY)] + [vmem] * 8,
            out_specs=vmem,
            scratch_shapes=[pltpu.VMEM((n_pad, n_pad), adj_dt),
                            pltpu.SemaphoreType.DMA],
            compiler_params=pltpu.CompilerParams(vmem_limit_bytes=usable),
        )(*inputs)
        return out.reshape(G, 1)

    # ---------------- row-tiled path (grid over destination-row tiles) ----------------
    n_tiles = n_pad // row_tile
    adj_resident = not stream_adj
    adj_spec = (pl.BlockSpec((n_pad, n_pad), lambda r: (0, 0)) if adj_resident
                else pl.BlockSpec((row_tile, n_pad), lambda r: (r, 0)))

    xv_call = pl.pallas_call(
        gnnml1_xv_kernel,
        out_shape=jax.ShapeDtypeStruct((n_pad, NOUT), adj_dt),
        in_specs=[vmem, vmem],
        out_specs=vmem,
        compiler_params=pltpu.CompilerParams(vmem_limit_bytes=usable),
    )

    layer_call = pl.pallas_call(
        functools.partial(gnnml1_layer_kernel,
                          row_tile=row_tile, adj_resident=adj_resident),
        out_shape=jax.ShapeDtypeStruct((n_pad, NIN), jnp.float32),
        grid=(n_tiles,),
        in_specs=[
            pl.BlockSpec((row_tile, NIN), lambda r: (r, 0)),   # h rows of this tile
            adj_spec,                                          # adj (streamed or resident)
            pl.BlockSpec((n_pad, NOUT), lambda r: (0, 0)),     # precomputed xv
            pl.BlockSpec((NIN, 3 * NOUT), lambda r: (0, 0)),
            pl.BlockSpec((1, 3 * NOUT), lambda r: (0, 0)),
            pl.BlockSpec((1, NOUT), lambda r: (0, 0)),
        ],
        out_specs=pl.BlockSpec((row_tile, NIN), lambda r: (r, 0)),
        compiler_params=pltpu.CompilerParams(
            dimension_semantics=("parallel",),    # independent dest-row tiles -> megacore
            vmem_limit_bytes=usable),
    )

    h = x_pad
    for p in layers:
        wabc = jnp.concatenate([pad_rows(p["wa"]), pad_rows(p["wb"]),
                                pad_rows(p["wc"])], axis=1).astype(cdt)            # [48,48]
        babc = jnp.concatenate([p["ba"], p["bb"], p["bc"]]).reshape(1, 3 * NOUT)   # [1,48]
        wv = pad_rows(p["wv"]).astype(cdt)                                         # [48,16]
        bv = p["bv"].reshape(1, NOUT)                                              # [1,16]
        xv = xv_call(h, wv)                                                        # [N,16]
        h = layer_call(h, adj_p, xv, wabc, babc, bv)

    head_in = (h, pool_p, f1w, f1b, f2wt, f2b)
    out = pl.pallas_call(
        gnnml1_head_kernel,
        out_shape=jax.ShapeDtypeStruct((1, G), jnp.float32),
        in_specs=[vmem] * len(head_in),
        out_specs=vmem,
        compiler_params=pltpu.CompilerParams(vmem_limit_bytes=usable),
    )(*head_in)
    return out.reshape(G, 1)


# ----------------------------------------------------------------------------- params & reference

def init_params(key, num_features):
    """Deterministic synthetic parameters (shapes follow GNNML1.__init__)."""
    def dense(k, din, dout):
        k1, k2 = jax.random.split(k)
        w = jax.random.normal(k1, (din, dout), jnp.float32) * 0.1
        b = jax.random.normal(k2, (dout,), jnp.float32) * 0.1
        return w, b

    keys = jax.random.split(key, NLAYERS * 4 + 2)
    ki = 0
    layers = []
    din = num_features
    for _ in range(NLAYERS):
        wa, ba = dense(keys[ki], din, NOUT); ki += 1          # fcX1
        wv, bv = dense(keys[ki], din, NOUT); ki += 1          # SpectConv weight[0], bias
        wb, bb = dense(keys[ki], din, NOUT); ki += 1          # fcX2
        wc, bc = dense(keys[ki], din, NOUT); ki += 1          # fcX3
        layers.append(dict(wa=wa, ba=ba, wv=wv, bv=bv, wb=wb, bb=bb, wc=wc, bc=bc))
        din = NIN
    f1w, f1b = dense(keys[ki], NIN, HID); ki += 1
    f2w, f2b = dense(keys[ki], HID, 1); ki += 1
    return dict(layers=layers, f1w=f1w, f1b=f1b, f2w=f2w, f2b=f2b)


def reference_forward(x, adj, pool, params, *, mxu_dtype=jnp.float32):
    """Pure-JAX mirror of the torch forward (concat=True).  mxu_dtype=bf16 mirrors the
    kernel's bf16 MXU-operand casts (f32 accumulation, f32 elementwise math)."""
    f32 = jnp.float32
    dt = mxu_dtype

    def mm(a, b):
        return jnp.dot(a.astype(dt), b.astype(dt), preferred_element_type=f32)

    h = x
    for p in params["layers"]:
        h1 = jax.nn.relu(mm(h, p["wa"]) + p["ba"])
        xv = mm(h, p["wv"])                                          # h @ Wv
        h2 = jax.nn.relu(jnp.dot(adj.astype(dt), xv.astype(dt),      # SpectConv, edge_attr=1
                                 preferred_element_type=f32) + p["bv"])
        h3 = jax.nn.relu((mm(h, p["wb"]) + p["bb"]) * (mm(h, p["wc"]) + p["bc"]))
        h = jnp.concatenate([h1, h2, h3], axis=1)
    pooled = jnp.dot(pool.astype(dt), h.astype(dt), preferred_element_type=f32)  # global_add_pool
    z = jax.nn.relu(jnp.dot(pooled, params["f1w"], preferred_element_type=f32) + params["f1b"])
    return jnp.dot(z, params["f2w"], preferred_element_type=f32) + params["f2b"]


# ----------------------------------------------------------------------------- demo

if __name__ == "__main__":
    key = jax.random.PRNGKey(0)
    kx, kp = jax.random.split(key)

    F = 21                 # ZINC atom-type feature width
    nodes_per_graph = 8
    G = 2                  # two graphs in the batch
    N = G * nodes_per_graph

    x = jax.random.normal(kx, (N, F), jnp.float32)

    # bidirectional ring graphs; dense adjacency adj[dst, src] = 1 (edge_attr = ones)
    adj_np = np.zeros((N, N), np.float32)
    batch_np = np.zeros((N,), np.int32)
    for g in range(G):
        base = g * nodes_per_graph
        for i in range(nodes_per_graph):
            s = base + i
            d = base + (i + 1) % nodes_per_graph
            adj_np[d, s] = 1.0
            adj_np[s, d] = 1.0
            batch_np[s] = g
    pool_np = np.zeros((G, N), np.float32)
    pool_np[batch_np, np.arange(N)] = 1.0

    adj = jnp.asarray(adj_np)
    pool = jnp.asarray(pool_np)
    params = init_params(kp, F)

    ref_f32 = np.asarray(reference_forward(x, adj, pool, params))
    ref_bf16 = np.asarray(reference_forward(x, adj, pool, params, mxu_dtype=jnp.bfloat16))

    # 1) auto (fused, adj DMA overlapped), full f32 -> exact semantics
    out = jax.block_until_ready(gnnml1_forward(x, adj, pool, params, use_bf16=False))
    assert out.shape == (G, 1)
    np.testing.assert_allclose(np.asarray(out), ref_f32, rtol=1e-4, atol=1e-4)

    # 2) auto (fused), default bf16 MXU operands -> tight vs bf16-mirrored reference
    out_bf = jax.block_until_ready(gnnml1_forward(x, adj, pool, params))
    np.testing.assert_allclose(np.asarray(out_bf), ref_bf16, rtol=2e-3, atol=2e-3)
    np.testing.assert_allclose(np.asarray(out_bf), ref_f32, rtol=5e-2, atol=5e-2)

    # 3) row-tiled, streamed adj (large-graph config), f32 -> exact semantics
    out_ts = jax.block_until_ready(
        gnnml1_forward(x, adj, pool, params, use_bf16=False, row_tile=8, stream_adj=True))
    np.testing.assert_allclose(np.asarray(out_ts), ref_f32, rtol=1e-4, atol=1e-4)

    # 4) row-tiled, resident adj (v7x megacore config), bf16 -> tight vs bf16 reference
    out_tr = jax.block_until_ready(
        gnnml1_forward(x, adj, pool, params, use_bf16=True, row_tile=8, stream_adj=False))
    np.testing.assert_allclose(np.asarray(out_tr), ref_bf16, rtol=2e-3, atol=2e-3)

    print("KERNEL_OK")
</pallas_src>

<mosaic_0001>
module attributes {stable_mosaic.version = 11 : i64} {
  func.func @gnnml1_fused_kernel(%arg0: memref<16x48xf32, #tpu.memory_space<vmem>>, %arg1: memref<16x16xf32, #tpu.memory_space<any>>, %arg2: memref<2x16xf32, #tpu.memory_space<vmem>>, %arg3: memref<4x48x64xf32, #tpu.memory_space<vmem>>, %arg4: memref<4x1x64xf32, #tpu.memory_space<vmem>>, %arg5: memref<4x1x16xf32, #tpu.memory_space<vmem>>, %arg6: memref<48x32xf32, #tpu.memory_space<vmem>>, %arg7: memref<1x32xf32, #tpu.memory_space<vmem>>, %arg8: memref<1x32xf32, #tpu.memory_space<vmem>>, %arg9: memref<1x1xf32, #tpu.memory_space<vmem>>, %arg10: memref<1x2xf32, #tpu.memory_space<vmem>>, %arg11: memref<16x16xf32, #tpu.memory_space<vmem>>, %arg12: memref<!tpu.dma_semaphore, #tpu.memory_space<semaphore_mem>>) attributes {dimension_semantics = [], scalar_prefetch = 0 : i64, scratch_operands = 2 : i64, tpu.core_type = #tpu.core_type<tc>} {
    tpu.enqueue_dma source(%arg1 : memref<16x16xf32, #tpu.memory_space<any>>) target(%arg11 : memref<16x16xf32, #tpu.memory_space<vmem>>) target_semaphore(%arg12 : memref<!tpu.dma_semaphore, #tpu.memory_space<semaphore_mem>>)
    %c0 = arith.constant 0 : index
    %c0_0 = arith.constant 0 : index
    %0 = vector.load %arg0[%c0, %c0_0] : memref<16x48xf32, #tpu.memory_space<vmem>>, vector<16x48xf32>
    %c0_1 = arith.constant 0 : index
    %c0_2 = arith.constant 0 : index
    %c0_3 = arith.constant 0 : index
    %1 = vector.load %arg3[%c0_1, %c0_2, %c0_3] : memref<4x48x64xf32, #tpu.memory_space<vmem>>, vector<1x48x64xf32>
    %2 = vector.shape_cast %1 : vector<1x48x64xf32> to vector<48x64xf32>
    %cst = arith.constant dense<0.000000e+00> : vector<16x64xf32>
    %3 = tpu.matmul %0, %2, %cst {dimension_numbers = #tpu.dot_dimension_numbers<[1], [0], [0], [1], [0, 0, 1, 1], [], []>} : vector<16x48xf32>, vector<48x64xf32>, vector<16x64xf32> -> vector<16x64xf32>
    %c0_4 = arith.constant 0 : index
    %c0_5 = arith.constant 0 : index
    %c0_6 = arith.constant 0 : index
    %4 = vector.load %arg4[%c0_4, %c0_5, %c0_6] : memref<4x1x64xf32, #tpu.memory_space<vmem>>, vector<1x1x64xf32>
    %5 = vector.shape_cast %4 : vector<1x1x64xf32> to vector<1x64xf32>
    %6 = vector.broadcast %5 : vector<1x64xf32> to vector<16x64xf32>
    %7 = arith.addf %3, %6 : vector<16x64xf32>
    %8 = vector.extract_strided_slice %7 {offsets = [0, 0], sizes = [16, 16], strides = [1, 1]} : vector<16x64xf32> to vector<16x16xf32>
    %cst_7 = arith.constant 0.000000e+00 : f32
    %9 = vector.broadcast %cst_7 : f32 to vector<16x16xf32>
    %10 = arith.maximumf %8, %9 : vector<16x16xf32>
    %11 = vector.extract_strided_slice %7 {offsets = [0, 16], sizes = [16, 16], strides = [1, 1]} : vector<16x64xf32> to vector<16x16xf32>
    %12 = vector.extract_strided_slice %7 {offsets = [0, 32], sizes = [16, 16], strides = [1, 1]} : vector<16x64xf32> to vector<16x16xf32>
    %13 = vector.extract_strided_slice %7 {offsets = [0, 48], sizes = [16, 16], strides = [1, 1]} : vector<16x64xf32> to vector<16x16xf32>
    %14 = arith.mulf %12, %13 : vector<16x16xf32>
    %cst_8 = arith.constant 0.000000e+00 : f32
    %15 = vector.broadcast %cst_8 : f32 to vector<16x16xf32>
    %16 = arith.maximumf %14, %15 : vector<16x16xf32>
    tpu.wait_dma2 semaphore(%arg12 : memref<!tpu.dma_semaphore, #tpu.memory_space<semaphore_mem>>) src(%arg1 : memref<16x16xf32, #tpu.memory_space<any>>) dst(%arg11 : memref<16x16xf32, #tpu.memory_space<vmem>>)
    %c0_9 = arith.constant 0 : index
    %c0_10 = arith.constant 0 : index
    %17 = vector.load %arg11[%c0_9, %c0_10] : memref<16x16xf32, #tpu.memory_space<vmem>>, vector<16x16xf32>
    %cst_11 = arith.constant dense<0.000000e+00> : vector<16x16xf32>
    %18 = tpu.matmul %17, %11, %cst_11 {dimension_numbers = #tpu.dot_dimension_numbers<[1], [0], [0], [1], [0, 0, 1, 1], [], []>} : vector<16x16xf32>, vector<16x16xf32>, vector<16x16xf32> -> vector<16x16xf32>
    %c0_12 = arith.constant 0 : index
    %c0_13 = arith.constant 0 : index
    %c0_14 = arith.constant 0 : index
    %19 = vector.load %arg5[%c0_12, %c0_13, %c0_14] : memref<4x1x16xf32, #tpu.memory_space<vmem>>, vector<1x1x16xf32>
    %20 = vector.shape_cast %19 : vector<1x1x16xf32> to vector<1x16xf32>
    %21 = vector.broadcast %20 : vector<1x16xf32> to vector<16x16xf32>
    %22 = arith.addf %18, %21 : vector<16x16xf32>
    %cst_15 = arith.constant 0.000000e+00 : f32
    %23 = vector.broadcast %cst_15 : f32 to vector<16x16xf32>
    %24 = arith.maximumf %22, %23 : vector<16x16xf32>
    %25 = tpu.concatenate %10, %24, %16 in 1 : vector<16x16xf32>, vector<16x16xf32>, vector<16x16xf32> -> vector<16x48xf32>
    %c1 = arith.constant 1 : index
    %c0_16 = arith.constant 0 : index
    %c0_17 = arith.constant 0 : index
    %26 = vector.load %arg3[%c1, %c0_16, %c0_17] : memref<4x48x64xf32, #tpu.memory_space<vmem>>, vector<1x48x64xf32>
    %27 = vector.shape_cast %26 : vector<1x48x64xf32> to vector<48x64xf32>
    %cst_18 = arith.constant dense<0.000000e+00> : vector<16x64xf32>
    %28 = tpu.matmul %25, %27, %cst_18 {dimension_numbers = #tpu.dot_dimension_numbers<[1], [0], [0], [1], [0, 0, 1, 1], [], []>} : vector<16x48xf32>, vector<48x64xf32>, vector<16x64xf32> -> vector<16x64xf32>
    %c1_19 = arith.constant 1 : index
    %c0_20 = arith.constant 0 : index
    %c0_21 = arith.constant 0 : index
    %29 = vector.load %arg4[%c1_19, %c0_20, %c0_21] : memref<4x1x64xf32, #tpu.memory_space<vmem>>, vector<1x1x64xf32>
    %30 = vector.shape_cast %29 : vector<1x1x64xf32> to vector<1x64xf32>
    %31 = vector.broadcast %30 : vector<1x64xf32> to vector<16x64xf32>
    %32 = arith.addf %28, %31 : vector<16x64xf32>
    %33 = vector.extract_strided_slice %32 {offsets = [0, 0], sizes = [16, 16], strides = [1, 1]} : vector<16x64xf32> to vector<16x16xf32>
    %cst_22 = arith.constant 0.000000e+00 : f32
    %34 = vector.broadcast %cst_22 : f32 to vector<16x16xf32>
    %35 = arith.maximumf %33, %34 : vector<16x16xf32>
    %36 = vector.extract_strided_slice %32 {offsets = [0, 16], sizes = [16, 16], strides = [1, 1]} : vector<16x64xf32> to vector<16x16xf32>
    %37 = vector.extract_strided_slice %32 {offsets = [0, 32], sizes = [16, 16], strides = [1, 1]} : vector<16x64xf32> to vector<16x16xf32>
    %38 = vector.extract_strided_slice %32 {offsets = [0, 48], sizes = [16, 16], strides = [1, 1]} : vector<16x64xf32> to vector<16x16xf32>
    %39 = arith.mulf %37, %38 : vector<16x16xf32>
    %cst_23 = arith.constant 0.000000e+00 : f32
    %40 = vector.broadcast %cst_23 : f32 to vector<16x16xf32>
    %41 = arith.maximumf %39, %40 : vector<16x16xf32>
    %cst_24 = arith.constant dense<0.000000e+00> : vector<16x16xf32>
    %42 = tpu.matmul %17, %36, %cst_24 {dimension_numbers = #tpu.dot_dimension_numbers<[1], [0], [0], [1], [0, 0, 1, 1], [], []>} : vector<16x16xf32>, vector<16x16xf32>, vector<16x16xf32> -> vector<16x16xf32>
    %c1_25 = arith.constant 1 : index
    %c0_26 = arith.constant 0 : index
    %c0_27 = arith.constant 0 : index
    %43 = vector.load %arg5[%c1_25, %c0_26, %c0_27] : memref<4x1x16xf32, #tpu.memory_space<vmem>>, vector<1x1x16xf32>
    %44 = vector.shape_cast %43 : vector<1x1x16xf32> to vector<1x16xf32>
    %45 = vector.broadcast %44 : vector<1x16xf32> to vector<16x16xf32>
    %46 = arith.addf %42, %45 : vector<16x16xf32>
    %cst_28 = arith.constant 0.000000e+00 : f32
    %47 = vector.broadcast %cst_28 : f32 to vector<16x16xf32>
    %48 = arith.maximumf %46, %47 : vector<16x16xf32>
    %49 = tpu.concatenate %35, %48, %41 in 1 : vector<16x16xf32>, vector<16x16xf32>, vector<16x16xf32> -> vector<16x48xf32>
    %c2 = arith.constant 2 : index
    %c0_29 = arith.constant 0 : index
    %c0_30 = arith.constant 0 : index
    %50 = vector.load %arg3[%c2, %c0_29, %c0_30] : memref<4x48x64xf32, #tpu.memory_space<vmem>>, vector<1x48x64xf32>
    %51 = vector.shape_cast %50 : vector<1x48x64xf32> to vector<48x64xf32>
    %cst_31 = arith.constant dense<0.000000e+00> : vector<16x64xf32>
    %52 = tpu.matmul %49, %51, %cst_31 {dimension_numbers = #tpu.dot_dimension_numbers<[1], [0], [0], [1], [0, 0, 1, 1], [], []>} : vector<16x48xf32>, vector<48x64xf32>, vector<16x64xf32> -> vector<16x64xf32>
    %c2_32 = arith.constant 2 : index
    %c0_33 = arith.constant 0 : index
    %c0_34 = arith.constant 0 : index
    %53 = vector.load %arg4[%c2_32, %c0_33, %c0_34] : memref<4x1x64xf32, #tpu.memory_space<vmem>>, vector<1x1x64xf32>
    %54 = vector.shape_cast %53 : vector<1x1x64xf32> to vector<1x64xf32>
    %55 = vector.broadcast %54 : vector<1x64xf32> to vector<16x64xf32>
    %56 = arith.addf %52, %55 : vector<16x64xf32>
    %57 = vector.extract_strided_slice %56 {offsets = [0, 0], sizes = [16, 16], strides = [1, 1]} : vector<16x64xf32> to vector<16x16xf32>
    %cst_35 = arith.constant 0.000000e+00 : f32
    %58 = vector.broadcast %cst_35 : f32 to vector<16x16xf32>
    %59 = arith.maximumf %57, %58 : vector<16x16xf32>
    %60 = vector.extract_strided_slice %56 {offsets = [0, 16], sizes = [16, 16], strides = [1, 1]} : vector<16x64xf32> to vector<16x16xf32>
    %61 = vector.extract_strided_slice %56 {offsets = [0, 32], sizes = [16, 16], strides = [1, 1]} : vector<16x64xf32> to vector<16x16xf32>
    %62 = vector.extract_strided_slice %56 {offsets = [0, 48], sizes = [16, 16], strides = [1, 1]} : vector<16x64xf32> to vector<16x16xf32>
    %63 = arith.mulf %61, %62 : vector<16x16xf32>
    %cst_36 = arith.constant 0.000000e+00 : f32
    %64 = vector.broadcast %cst_36 : f32 to vector<16x16xf32>
    %65 = arith.maximumf %63, %64 : vector<16x16xf32>
    %cst_37 = arith.constant dense<0.000000e+00> : vector<16x16xf32>
    %66 = tpu.matmul %17, %60, %cst_37 {dimension_numbers = #tpu.dot_dimension_numbers<[1], [0], [0], [1], [0, 0, 1, 1], [], []>} : vector<16x16xf32>, vector<16x16xf32>, vector<16x16xf32> -> vector<16x16xf32>
    %c2_38 = arith.constant 2 : index
    %c0_39 = arith.constant 0 : index
    %c0_40 = arith.constant 0 : index
    %67 = vector.load %arg5[%c2_38, %c0_39, %c0_40] : memref<4x1x16xf32, #tpu.memory_space<vmem>>, vector<1x1x16xf32>
    %68 = vector.shape_cast %67 : vector<1x1x16xf32> to vector<1x16xf32>
    %69 = vector.broadcast %68 : vector<1x16xf32> to vector<16x16xf32>
    %70 = arith.addf %66, %69 : vector<16x16xf32>
    %cst_41 = arith.constant 0.000000e+00 : f32
    %71 = vector.broadcast %cst_41 : f32 to vector<16x16xf32>
    %72 = arith.maximumf %70, %71 : vector<16x16xf32>
    %73 = tpu.concatenate %59, %72, %65 in 1 : vector<16x16xf32>, vector<16x16xf32>, vector<16x16xf32> -> vector<16x48xf32>
    %c3 = arith.constant 3 : index
    %c0_42 = arith.constant 0 : index
    %c0_43 = arith.constant 0 : index
    %74 = vector.load %arg3[%c3, %c0_42, %c0_43] : memref<4x48x64xf32, #tpu.memory_space<vmem>>, vector<1x48x64xf32>
    %75 = vector.shape_cast %74 : vector<1x48x64xf32> to vector<48x64xf32>
    %cst_44 = arith.constant dense<0.000000e+00> : vector<16x64xf32>
    %76 = tpu.matmul %73, %75, %cst_44 {dimension_numbers = #tpu.dot_dimension_numbers<[1], [0], [0], [1], [0, 0, 1, 1], [], []>} : vector<16x48xf32>, vector<48x64xf32>, vector<16x64xf32> -> vector<16x64xf32>
    %c3_45 = arith.constant 3 : index
    %c0_46 = arith.constant 0 : index
    %c0_47 = arith.constant 0 : index
    %77 = vector.load %arg4[%c3_45, %c0_46, %c0_47] : memref<4x1x64xf32, #tpu.memory_space<vmem>>, vector<1x1x64xf32>
    %78 = vector.shape_cast %77 : vector<1x1x64xf32> to vector<1x64xf32>
    %79 = vector.broadcast %78 : vector<1x64xf32> to vector<16x64xf32>
    %80 = arith.addf %76, %79 : vector<16x64xf32>
    %81 = vector.extract_strided_slice %80 {offsets = [0, 0], sizes = [16, 16], strides = [1, 1]} : vector<16x64xf32> to vector<16x16xf32>
    %cst_48 = arith.constant 0.000000e+00 : f32
    %82 = vector.broadcast %cst_48 : f32 to vector<16x16xf32>
    %83 = arith.maximumf %81, %82 : vector<16x16xf32>
    %84 = vector.extract_strided_slice %80 {offsets = [0, 16], sizes = [16, 16], strides = [1, 1]} : vector<16x64xf32> to vector<16x16xf32>
    %85 = vector.extract_strided_slice %80 {offsets = [0, 32], sizes = [16, 16], strides = [1, 1]} : vector<16x64xf32> to vector<16x16xf32>
    %86 = vector.extract_strided_slice %80 {offsets = [0, 48], sizes = [16, 16], strides = [1, 1]} : vector<16x64xf32> to vector<16x16xf32>
    %87 = arith.mulf %85, %86 : vector<16x16xf32>
    %cst_49 = arith.constant 0.000000e+00 : f32
    %88 = vector.broadcast %cst_49 : f32 to vector<16x16xf32>
    %89 = arith.maximumf %87, %88 : vector<16x16xf32>
    %cst_50 = arith.constant dense<0.000000e+00> : vector<16x16xf32>
    %90 = tpu.matmul %17, %84, %cst_50 {dimension_numbers = #tpu.dot_dimension_numbers<[1], [0], [0], [1], [0, 0, 1, 1], [], []>} : vector<16x16xf32>, vector<16x16xf32>, vector<16x16xf32> -> vector<16x16xf32>
    %c3_51 = arith.constant 3 : index
    %c0_52 = arith.constant 0 : index
    %c0_53 = arith.constant 0 : index
    %91 = vector.load %arg5[%c3_51, %c0_52, %c0_53] : memref<4x1x16xf32, #tpu.memory_space<vmem>>, vector<1x1x16xf32>
    %92 = vector.shape_cast %91 : vector<1x1x16xf32> to vector<1x16xf32>
    %93 = vector.broadcast %92 : vector<1x16xf32> to vector<16x16xf32>
    %94 = arith.addf %90, %93 : vector<16x16xf32>
    %cst_54 = arith.constant 0.000000e+00 : f32
    %95 = vector.broadcast %cst_54 : f32 to vector<16x16xf32>
    %96 = arith.maximumf %94, %95 : vector<16x16xf32>
    %97 = tpu.concatenate %83, %96, %89 in 1 : vector<16x16xf32>, vector<16x16xf32>, vector<16x16xf32> -> vector<16x48xf32>
    %c0_55 = arith.constant 0 : index
    %c0_56 = arith.constant 0 : index
    %98 = vector.load %arg2[%c0_55, %c0_56] : memref<2x16xf32, #tpu.memory_space<vmem>>, vector<2x16xf32>
    %c0_57 = arith.constant 0 : index
    %c0_58 = arith.constant 0 : index
    %99 = vector.load %arg6[%c0_57, %c0_58] : memref<48x32xf32, #tpu.memory_space<vmem>>, vector<48x32xf32>
    %c0_59 = arith.constant 0 : index
    %c0_60 = arith.constant 0 : index
    %100 = vector.load %arg7[%c0_59, %c0_60] : memref<1x32xf32, #tpu.memory_space<vmem>>, vector<1x32xf32>
    %c0_61 = arith.constant 0 : index
    %c0_62 = arith.constant 0 : index
    %101 = vector.load %arg8[%c0_61, %c0_62] : memref<1x32xf32, #tpu.memory_space<vmem>>, vector<1x32xf32>
    %c0_63 = arith.constant 0 : index
    %c0_64 = arith.constant 0 : index
    %102 = vector.load %arg9[%c0_63, %c0_64] : memref<1x1xf32, #tpu.memory_space<vmem>>, vector<1x1xf32>
    %cst_65 = arith.constant dense<0.000000e+00> : vector<2x48xf32>
    %103 = tpu.matmul %98, %97, %cst_65 {dimension_numbers = #tpu.dot_dimension_numbers<[1], [0], [0], [1], [0, 0, 1, 1], [], []>} : vector<2x16xf32>, vector<16x48xf32>, vector<2x48xf32> -> vector<2x48xf32>
    %cst_66 = arith.constant dense<0.000000e+00> : vector<2x32xf32>
    %104 = tpu.matmul %103, %99, %cst_66 {dimension_numbers = #tpu.dot_dimension_numbers<[1], [0], [0], [1], [0, 0, 1, 1], [], []>} : vector<2x48xf32>, vector<48x32xf32>, vector<2x32xf32> -> vector<2x32xf32>
    %105 = vector.broadcast %100 : vector<1x32xf32> to vector<2x32xf32>
    %106 = arith.addf %104, %105 : vector<2x32xf32>
    %cst_67 = arith.constant 0.000000e+00 : f32
    %107 = vector.broadcast %cst_67 : f32 to vector<2x32xf32>
    %108 = arith.maximumf %106, %107 : vector<2x32xf32>
    %cst_68 = arith.constant dense<0.000000e+00> : vector<1x2xf32>
    %109 = tpu.matmul %101, %108, %cst_68 {dimension_numbers = #tpu.dot_dimension_numbers<[1], [1], [0], [0], [0, 0, 1, 0], [], []>} : vector<1x32xf32>, vector<2x32xf32>, vector<1x2xf32> -> vector<1x2xf32>
    %110 = vector.broadcast %102 : vector<1x1xf32> to vector<1x2xf32>
    %111 = arith.addf %109, %110 : vector<1x2xf32>
    %c0_69 = arith.constant 0 : index
    %c0_70 = arith.constant 0 : index
    %112 = vector.load %arg10[%c0_69, %c0_70] : memref<1x2xf32, #tpu.memory_space<vmem>>, vector<1x2xf32>
    tpu.vector_store %arg10[%c0_69, %c0_70], %111 {strides = array<i32>} : memref<1x2xf32, #tpu.memory_space<vmem>>, vector<1x2xf32>,
    return
  }
}

</mosaic_0001>

<bundles_post_ra>
// kernel: tpu_custom_call.1
= control target key start
LH: loop header
LB: loop body
LE: loop exit
PB: predicated region body
PF: predicated region fallthrough
CT: control target
= control target key end

     0   :  { %s1685_s0 = inlined_call_operand.vmem [shape: f32[16,48], index: 0, kind: input, shape index: {}]   ;;  %s1686_s1 = inlined_call_operand.vmem [shape: f32[16,16], index: 1, kind: input, shape index: {}]   ;;  %s1687_s2 = inlined_call_operand.vmem [shape: f32[2,16], index: 2, kind: input, shape index: {}]   ;;  %s1688_s3 = inlined_call_operand.hbm [shape: f32[4,48,64], index: 3, kind: input, shape index: {}]   ;;  %s1689_s4 = inlined_call_operand.vmem [shape: f32[4,1,64], index: 4, kind: input, shape index: {}]   ;;  %s1690_s5 = inlined_call_operand.vmem [shape: f32[4,1,16], index: 5, kind: input, shape index: {}]   ;;  %s1691_s6 = inlined_call_operand.vmem [shape: f32[48,32], index: 6, kind: input, shape index: {}]   ;;  %s1692_s7 = inlined_call_operand.vmem [shape: f32[1,32], index: 7, kind: input, shape index: {}]   ;;  %s1693_s8 = inlined_call_operand.vmem [shape: f32[1,32], index: 8, kind: input, shape index: {}]   ;;  %s1694_s9 = inlined_call_operand.<no memory space> [shape: f32[1,1], index: 9, kind: input, shape index: {}]   ;;  %s1695_s10 = inlined_call_operand.hbm [shape: f32[1,2], index: 10, kind: output, shape index: {}]  }
   0x1   :  { %v15_v0 = vstv %s1694_s9 }
   0x2   :  { %16 = vst [vmem:[#allocation4] sm:$0x1] %v15_v0 }
   0x3   :  { %17 = vsyncpa [#allocation6], 0 }
   0x4   :  { %18 = vsyncpa [#allocation7], 0  ;;  %s1482_s15 = smov [#allocation5]  }
   0x5   :  { %s28_s16 = sshll.u32 %s1482_s15, 4  ;;  %s29_s16 = int_to_ptr.vmem [resolvable:$true] %s28_s16 }
   0x6   :  { %s1444_s17 = scalar_lea.vmem %s29_s16, 3072  ;;  %p1449_p1 = scmp.lt.s32.totalorder %s29_s16, %s29_s16 }
   0x7   :  { %p1445_p0 = scmp.ne.s32.totalorder %s29_s16, %s1444_s17  ;;  %p1450_p2 = scmp.lt.s32.totalorder %s1444_s17, %s1444_s17 }
   0x9   :  { %p1451_p3 = por %p1450_p2, %p1449_p1 }
   0xb   :  { %p1452_p4 = pnand %p1451_p3, %p1445_p0 }
   0xd   :  { %1455 = shalt.err (!%p1452_p4)
}
   0xe   :  { %s1483_s18 = smov 128   ;;  %s1484_s19 = smov 8  }
   0xf   :  { %34 = dma.hbm_to_vmem [thread:$0]  %s1688_s3, 3072, %s29_s16, [#allocation6], %s1483_s18, %s1483_s18, %s1484_s19  }
  0x10   :  { %1476 = dma.done.wait [#allocation6], 3072  }
  0x11   :  { %1477 = vsyncadd [#allocation6], 4294964224  ;;  %v1555_v1 = vld [vmem:[%s1686_s1] sm:$0xff]  ;;  %v1560_v2 = vld [vmem:[%s1686_s1 + $0x8] sm:$0xff] }
  0x12   :  { %94 = vsyncadd [#allocation3], 256  ;;  %v102_v3 = vld [vmem:[#allocation5 + $0x28] sm:$0xff]  ;;  %v101_v4 = vld [vmem:[#allocation5 + $0x20] sm:$0xff]  ;;  %vm110_vm0 = vcmask 392192   ;;  %s1485_s29 = smov 112  }
  0x13   :  { %1311 = vmatprep.subr.mxu0 %v102_v3  ;;  %v100_v5 = vld [vmem:[#allocation5 + $0x18] sm:$0xff]  ;;  %v99_v7 = vld [vmem:[#allocation5 + $0x10] sm:$0xff]  ;;  %v98_v8 = vld [vmem:[#allocation5 + $0x8] sm:$0xff]  ;;  %vm218_vm1 = vcmask 130048  }
  0x14   :  { %1312 = vmatpush3.msra.mxu0 %v102_v3  ;;  %v95_v6 = vld [vmem:[%s1685_s0] sm:$0xff]  ;;  %v96_v10 = vld [vmem:[%s1685_s0 + $0x8] sm:$0xff] }
  0x15   :  { %1313 = vmatprep.subr.mxu0 %v101_v4  ;;  %1323 = vmatprep.mubr.msk.f32.mxu0 %vm110_vm0, %v95_v6  ;;  %v97_v9 = vld [vmem:[#allocation5] sm:$0xff]  ;;  %v1215_v11 = vld [vmem:[%s1689_s4] ss:$0 sm:$0xff] }
  0x16   :  { %1314 = vmatpush3.msra.mxu0 %v101_v4 }
  0x17   :  { %1315 = vmatprep.subr.mxu0 %v100_v5 }
  0x18   :  { %1316 = vmatpush3.msra.mxu0 %v100_v5 }
  0x19   :  { %1317 = vmatprep.subr.mxu0 %v99_v7 }
  0x1a   :  { %1318 = vmatpush3.msra.mxu0 %v99_v7 }
  0x1b   :  { %1319 = vmatprep.subr.mxu0 %v98_v8 }
  0x1c   :  { %1320 = vmatpush3.msra.mxu0 %v98_v8 }
  0x1d   :  { %1321 = vmatprep.subr.mxu0 %v97_v9 }
  0x1e   :  { %1322 = vmatpush3.msra.mxu0 %v97_v9 }
  0x1f   :  { %1324 = vmatmul.mubr.msk.f32.vlgmr.msra.gmra.mxu0 %vm110_vm0, %v96_v10 }
  0xdf   :  { %v1325_v12 = vpop.f32.mrf.mxu0 }
  0xe0   :  { %v189_v13 = vadd.f32 %v1325_v12, %v1215_v11 }
  0xe1   :  { %v183_v14 = vpop.f32.mrf.mxu0 }
  0xe2   :  { %v193_v15 = vmax.f32 %v189_v13, 0.0  ;;  %v184_v16 = vadd.f32 %v1215_v11, %v183_v14 }
  0xe4   :  { %v192_v17 = vmax.f32 %v184_v16, 0.0  ;;  %196 = vrot.lane.b32.xlu0 %v184_v16, %s1485_s29 }
  0xe8   :  { %198 = vrot.lane.b32.xlu0 %v189_v13, %s1485_s29 }
 0x156   :  { %v197_v18 = vpop.permute.xlu0 %196 }
 0x157   :  { %v202_v19 = vmul.f32 %v197_v18, %v184_v16 }
 0x159   :  { %v204_v20 = vmax.f32 %v202_v19, 0.0 }
 0x15a   :  { %v199_v21 = vpop.permute.xlu0 %198 }
 0x15b   :  { %v203_v22 = vmul.f32 %v199_v21, %v189_v13  ;;  %1326 = vmatprep.subr.mxu1 %v199_v21 }
 0x15d   :  { %v205_v23 = vmax.f32 %v203_v22, 0.0 }
 0x15e   :  { %1478 = dma.done.wait [#allocation3], 256 }
 0x15f   :  { %1479 = vsyncadd [#allocation3], 4294967040  ;;  %1327 = vmatpush3.msra.mxu1 %v199_v21  ;;  %1330 = vmatprep.mubr.msk.f32.mxu1 %vm218_vm1, %v1555_v1  ;;  %v321_v24 = vld [vmem:[#allocation5 + $0x58] sm:$0xff]  ;;  %v320_v25 = vld [vmem:[#allocation5 + $0x50] sm:$0xff]  ;;  %s1486_s11 = smov 16   ;;  %vm312_vm2 = vcmask 261120  }
 0x160   :  { %1328 = vmatprep.subr.mxu1 %v197_v18  ;;  %1352 = vmatprep.mubr.msk.f32.mxu0 %vm218_vm1, %v1555_v1  ;;  %v319_v26 = vld [vmem:[#allocation5 + $0x48] sm:$0xff]  ;;  %v318_v27 = vld [vmem:[#allocation5 + $0x40] sm:$0xff]  ;;  %v317_v28 = vld [vmem:[#allocation5 + $0x38] sm:$0xff]  ;;  %vm1488_vm3 = vmmov 0   ;;  %s1490_s14 = smov [#allocation8]   ;;  %vm1184_vm4 = vcmask 8192  }
 0x161   :  { %1329 = vmatpush3.msra.mxu1 %v197_v18  ;;  %v316_v29 = vld [vmem:[#allocation5 + $0x30] sm:$0xff]  ;;  %v1218_v31 = vld [vmem:[%s1690_s5] ss:$0 sm:$0xff]  ;;  %v1222_v43 = vld [vmem:[%s1689_s4 + $0x1] ss:$0 sm:$0xff]  ;;  %s1192_s15 = sshll.u32 %s1490_s14, 4  ;;  %s1193_s15 = int_to_ptr.vmem [resolvable:$true] %s1192_s15 }
 0x162   :  { %1331 = vmatmul.mubr.msk.f32.vlgmr.msra.gmra.mxu1 %vm218_vm1, %v1560_v2  ;;  %1333 = vmatprep.subr.mxu1 %v321_v24  ;;  %v528_v50 = vld [vmem:[#allocation5 + $0x88] sm:$0xff]  ;;  %v527_v51 = vld [vmem:[#allocation5 + $0x80] sm:$0xff]  ;;  %v526_v52 = vld [vmem:[#allocation5 + $0x78] sm:$0xff]  ;;  %s1460_s16 = scalar_lea.vmem %s1193_s15, 32  ;;  %p1461_p6 = scmp.lt.s32.totalorder %s1193_s15, %s1193_s15 }
 0x163   :  { %1334 = vmatpush3.msra.mxu1 %v321_v24  ;;  %v525_v53 = vld [vmem:[#allocation5 + $0x70] sm:$0xff]  ;;  %v524_v54 = vld [vmem:[#allocation5 + $0x68] sm:$0xff]  ;;  %v523_v55 = vld [vmem:[#allocation5 + $0x60] sm:$0xff] }
 0x164   :  { %1335 = vmatprep.subr.mxu1 %v320_v25  ;;  %v1226_v56 = vld [vmem:[%s1690_s5 + $0x1] ss:$0 sm:$0xff]  ;;  %v1230_v13 = vld [vmem:[%s1689_s4 + $0x2] ss:$0 sm:$0xff]  ;;  %v733_v21 = vld [vmem:[#allocation5 + $0xa8] sm:$0xff] }
 0x165   :  { %1336 = vmatpush3.msra.mxu1 %v320_v25  ;;  %v732_v22 = vld [vmem:[#allocation5 + $0xa0] sm:$0xff]  ;;  %v730_v24 = vld [vmem:[#allocation5 + $0x90] sm:$0xff] }
 0x166   :  { %1337 = vmatprep.subr.mxu1 %v319_v26  ;;  %v1234_v25 = vld [vmem:[%s1690_s5 + $0x2] ss:$0 sm:$0xff] }
 0x167   :  { %1338 = vmatpush3.msra.mxu1 %v319_v26 }
 0x168   :  { %1339 = vmatprep.subr.mxu1 %v318_v27 }
 0x169   :  { %1340 = vmatpush3.msra.mxu1 %v318_v27 }
 0x16a   :  { %1341 = vmatprep.subr.mxu1 %v317_v28 }
 0x16b   :  { %1342 = vmatpush3.msra.mxu1 %v317_v28 }
 0x16c   :  { %1343 = vmatprep.subr.mxu1 %v316_v29 }
 0x16d   :  { %1344 = vmatpush3.msra.mxu1 %v316_v29 }
 0x222   :  { %v1332_v30 = vpop.f32.mrf.mxu1 }
 0x223   :  { %v297_v34 = vadd.f32 %v1332_v30, %v1218_v31 }
 0x224   :  { %v291_v32 = vpop.f32.mrf.mxu1 }
 0x225   :  { %v292_v33 = vadd.f32 %v1218_v31, %v291_v32  ;;  %v301_v36 = vmax.f32 %v297_v34, 0.0 }
 0x227   :  { %v300_v35 = vmax.f32 %v292_v33, 0.0 }
 0x229   :  { %304 = vrot.lane.b32.xlu0 %v300_v35, %s1486_s11 }
 0x22d   :  { %306 = vrot.lane.b32.xlu0 %v301_v36, %s1486_s11 }
 0x29b   :  { %v305_v37 = vpop.permute.xlu0 %304 }
 0x29c   :  { %v310_v38 = vsel %vm218_vm1, %v192_v17, %v305_v37 }
 0x29d   :  { %v313_v39 = vsel %vm312_vm2, %v310_v38, %v204_v20  ;;  %v734_v20 = vld [vmem:[#allocation5 + $0xb0] sm:$0xff] }
 0x29e   :  { %1345 = vmatprep.mubr.msk.f32.mxu1 %vm110_vm0, %v313_v39 }
 0x29f   :  { %v307_v40 = vpop.permute.xlu0 %306 }
 0x2a0   :  { %v311_v41 = vsel %vm218_vm1, %v193_v15, %v307_v40 }
 0x2a1   :  { %v314_v42 = vsel %vm312_vm2, %v311_v41, %v205_v23  ;;  %v731_v23 = vld [vmem:[#allocation5 + $0x98] sm:$0xff] }
 0x2a2   :  { %1346 = vmatmul.mubr.msk.f32.vlgmr.msra.gmra.mxu1 %vm110_vm0, %v314_v42 }
 0x2a3   :  { %1374 = vmatprep.mubr.msk.f32.mxu1 %vm218_vm1, %v1555_v1 }
 0x362   :  { %v1347_v44 = vpop.f32.mrf.mxu1 }
 0x363   :  { %v408_v45 = vadd.f32 %v1347_v44, %v1222_v43  ;;  %v1238_v44 = vld [vmem:[%s1689_s4 + $0x3] ss:$0 sm:$0xff] }
 0x364   :  { %v402_v46 = vpop.f32.mrf.mxu1 }
 0x365   :  { %417 = vrot.lane.b32.xlu1 %v408_v45, %s1485_s29  ;;  %v403_v47 = vadd.f32 %v1222_v43, %v402_v46  ;;  %v412_v3 = vmax.f32 %v408_v45, 0.0 }
 0x367   :  { %v411_v5 = vmax.f32 %v403_v47, 0.0 }
 0x369   :  { %415 = vrot.lane.b32.xlu1 %v403_v47, %s1485_s29 }
 0x3d7   :  { %v418_v48 = vpop.permute.xlu1 %417 }
 0x3d8   :  { %1348 = vmatprep.subr.mxu0 %v418_v48  ;;  %v422_v0 = vmul.f32 %v418_v48, %v408_v45 }
 0x3d9   :  { %1349 = vmatpush3.msra.mxu0 %v418_v48 }
 0x3da   :  { %v424_v9 = vmax.f32 %v422_v0, 0.0 }
 0x3db   :  { %v416_v49 = vpop.permute.xlu1 %415 }
 0x3dc   :  { %1350 = vmatprep.subr.mxu0 %v416_v49  ;;  %v421_v63 = vmul.f32 %v416_v49, %v403_v47 }
 0x3dd   :  { %1351 = vmatpush3.msra.mxu0 %v416_v49 }
 0x3de   :  { %1353 = vmatmul.mubr.msk.f32.vlgmr.msra.gmra.mxu0 %vm218_vm1, %v1560_v2  ;;  %1355 = vmatprep.subr.mxu0 %v528_v50  ;;  %v423_v6 = vmax.f32 %v421_v63, 0.0 }
 0x3df   :  { %1356 = vmatpush3.msra.mxu0 %v528_v50 }
 0x3e0   :  { %1357 = vmatprep.subr.mxu0 %v527_v51 }
 0x3e1   :  { %1358 = vmatpush3.msra.mxu0 %v527_v51  ;;  %v1487_v51 = vmov 0.0  }
 0x3e2   :  { %1359 = vmatprep.subr.mxu0 %v526_v52 }
 0x3e3   :  { %1360 = vmatpush3.msra.mxu0 %v526_v52  ;;  %v942_v52 = vld [vmem:[%s1691_s6 + $0x28] sm:$0xff] }
 0x3e4   :  { %1361 = vmatprep.subr.mxu0 %v525_v53 }
 0x3e5   :  { %1362 = vmatpush3.msra.mxu0 %v525_v53  ;;  %v941_v53 = vld [vmem:[%s1691_s6 + $0x20] sm:$0xff] }
 0x3e6   :  { %1363 = vmatprep.subr.mxu0 %v524_v54 }
 0x3e7   :  { %1364 = vmatpush3.msra.mxu0 %v524_v54  ;;  %v940_v54 = vld [vmem:[%s1691_s6 + $0x18] sm:$0xff] }
 0x3e8   :  { %1365 = vmatprep.subr.mxu0 %v523_v55 }
 0x3e9   :  { %1366 = vmatpush3.msra.mxu0 %v523_v55 }
 0x49e   :  { %v1354_v57 = vpop.f32.mrf.mxu0 }
 0x49f   :  { %v505_v58 = vadd.f32 %v1354_v57, %v1226_v56  ;;  %v939_v57 = vld [vmem:[%s1691_s6 + $0x10] sm:$0xff] }
 0x4a0   :  { %v499_v59 = vpop.f32.mrf.mxu0 }
 0x4a1   :  { %v509_v60 = vmax.f32 %v505_v58, 0.0  ;;  %v500_v61 = vadd.f32 %v1226_v56, %v499_v59 }
 0x4a3   :  { %v508_v62 = vmax.f32 %v500_v61, 0.0  ;;  %514 = vrot.lane.b32.xlu1 %v509_v60, %s1486_s11  ;;  %v938_v61 = vld [vmem:[%s1691_s6 + $0x8] sm:$0xff] }
 0x4a5   :  { %512 = vrot.lane.b32.xlu0 %v508_v62, %s1486_s11 }
 0x515   :  { %v515_v4 = vpop.permute.xlu1 %514 }
 0x516   :  { %v519_v7 = vsel %vm218_vm1, %v412_v3, %v515_v4 }
 0x517   :  { %v513_v8 = vpop.permute.xlu0 %512  ;;  %v521_v12 = vsel %vm312_vm2, %v519_v7, %v424_v9 }
 0x518   :  { %v518_v10 = vsel %vm218_vm1, %v411_v5, %v513_v8 }
 0x519   :  { %v520_v11 = vsel %vm312_vm2, %v518_v10, %v423_v6 }
 0x51a   :  { %1367 = vmatprep.mubr.msk.f32.mxu0 %vm110_vm0, %v520_v11 }
 0x51b   :  { %1368 = vmatmul.mubr.msk.f32.vlgmr.msra.gmra.mxu0 %vm110_vm0, %v521_v12  ;;  %v936_v12 = vld [vmem:[%s1687_s2] sm:$0x3] }
 0x51c   :  { %1396 = vmatprep.mubr.msk.f32.mxu0 %vm218_vm1, %v1555_v1  ;;  %v735_v1 = vld [vmem:[#allocation5 + $0xb8] sm:$0xff] }
 0x5db   :  { %v1369_v14 = vpop.f32.mrf.mxu0 }
 0x5dc   :  { %v615_v15 = vadd.f32 %v1369_v14, %v1230_v13  ;;  %v937_v14 = vld [vmem:[%s1691_s6] sm:$0xff] }
 0x5dd   :  { %v609_v16 = vpop.f32.mrf.mxu0 }
 0x5de   :  { %v610_v17 = vadd.f32 %v1230_v13, %v609_v16  ;;  %624 = vrot.lane.b32.xlu0 %v615_v15, %s1485_s29  ;;  %v619_v34 = vmax.f32 %v615_v15, 0.0 }
 0x5e0   :  { %622 = vrot.lane.b32.xlu1 %v610_v17, %s1485_s29  ;;  %v618_v36 = vmax.f32 %v610_v17, 0.0 }
 0x650   :  { %v625_v18 = vpop.permute.xlu0 %624 }
 0x651   :  { %1370 = vmatprep.subr.mxu1 %v625_v18  ;;  %v629_v33 = vmul.f32 %v625_v18, %v615_v15 }
 0x652   :  { %1371 = vmatpush3.msra.mxu1 %v625_v18  ;;  %v623_v19 = vpop.permute.xlu1 %622  ;;  %v1489_v18 = vmov 0  }
 0x653   :  { %1372 = vmatprep.subr.mxu1 %v623_v19  ;;  %v628_v32 = vmul.f32 %v623_v19, %v610_v17  ;;  %v631_v40 = vmax.f32 %v629_v33, 0.0  ;;  %v945_v17 = vld [vmem:[#allocation4] sm:$0x1]  ;;  %1435 = vset.pattern.permute.xlu0 %v1489_v18 }
 0x654   :  { %1373 = vmatpush3.msra.mxu1 %v623_v19  ;;  %v1246_v19 = vld [vmem:[%s1692_s7] ss:$0 sm:$0xff]  ;;  %s1456_s7 = scalar_lea.vmem %s1193_s15, 16 }
 0x655   :  { %1375 = vmatmul.mubr.msk.f32.vlgmr.msra.gmra.mxu1 %vm218_vm1, %v1560_v2  ;;  %1377 = vmatprep.subr.mxu1 %v735_v1  ;;  %v630_v37 = vmax.f32 %v628_v32, 0.0  ;;  %p1457_p5 = scmp.ne.s32.totalorder %s1193_s15, %s1456_s7  ;;  %p1462_p7 = scmp.lt.s32.totalorder %s1460_s16, %s1456_s7 }
 0x656   :  { %1378 = vmatpush3.msra.mxu1 %v735_v1 }
 0x657   :  { %1379 = vmatprep.subr.mxu1 %v734_v20  ;;  %p1463_p8 = por %p1462_p7, %p1461_p6 }
 0x658   :  { %1380 = vmatpush3.msra.mxu1 %v734_v20 }
 0x659   :  { %1381 = vmatprep.subr.mxu1 %v733_v21  ;;  %p1464_p9 = pnand %p1463_p8, %p1457_p5 }
 0x65a   :  { %1382 = vmatpush3.msra.mxu1 %v733_v21 }
 0x65b   :  { %1383 = vmatprep.subr.mxu1 %v732_v22 }
 0x65c   :  { %1384 = vmatpush3.msra.mxu1 %v732_v22 }
 0x65d   :  { %1385 = vmatprep.subr.mxu1 %v731_v23 }
 0x65e   :  { %1386 = vmatpush3.msra.mxu1 %v731_v23  ;;  %v944_v23 = vld [vmem:[%s1693_s8] sm:$0x1] }
 0x65f   :  { %1387 = vmatprep.subr.mxu1 %v730_v24 }
 0x660   :  { %1388 = vmatpush3.msra.mxu1 %v730_v24  ;;  %v1104_v24 = vlaneseq }
 0x661   :  { %1406 = vmatprep.subr.mxu1 %v1487_v51 }
 0x715   :  { %v1376_v26 = vpop.f32.mrf.mxu1 }
 0x716   :  { %v712_v27 = vadd.f32 %v1376_v26, %v1234_v25 }
 0x717   :  { %v706_v28 = vpop.f32.mrf.mxu1 }
 0x718   :  { %v716_v29 = vmax.f32 %v712_v27, 0.0  ;;  %v707_v30 = vadd.f32 %v1234_v25, %v706_v28  ;;  %v1105_v25 = vshrl.u32 %v1104_v24, 7 }
 0x71a   :  { %v715_v31 = vmax.f32 %v707_v30, 0.0  ;;  %721 = vrot.lane.b32.xlu1 %v716_v29, %s1486_s11  ;;  %v1106_v26 = vsub.s32 0, %v1105_v25 }
 0x71c   :  { %719 = vrot.lane.b32.xlu0 %v715_v31, %s1486_s11 }
 0x78c   :  { %v722_v35 = vpop.permute.xlu1 %721 }
 0x78d   :  { %v726_v38 = vsel %vm218_vm1, %v619_v34, %v722_v35 }
 0x78e   :  { %v720_v39 = vpop.permute.xlu0 %719  ;;  %v728_v43 = vsel %vm312_vm2, %v726_v38, %v631_v40 }
 0x78f   :  { %v725_v41 = vsel %vm218_vm1, %v618_v36, %v720_v39 }
 0x790   :  { %v727_v42 = vsel %vm312_vm2, %v725_v41, %v630_v37 }
 0x791   :  { %1389 = vmatprep.mubr.msk.f32.mxu1 %vm110_vm0, %v727_v42 }
 0x792   :  { %1390 = vmatmul.mubr.msk.f32.vlgmr.msra.gmra.mxu1 %vm110_vm0, %v728_v43 }
 0x793   :  { %1418 = vmatprep.mubr.msk.f32.mxu1 %vm1488_vm3, %v1487_v51  ;;  %1407 = vmatpush3.msra.mxu1 %v942_v52 }
 0x794   :  { %1408 = vmatprep.subr.mxu1 %v1487_v51 }
 0x795   :  { %1409 = vmatpush3.msra.mxu1 %v941_v53 }
 0x796   :  { %1410 = vmatprep.subr.mxu1 %v1487_v51 }
 0x797   :  { %1411 = vmatpush3.msra.mxu1 %v940_v54 }
 0x798   :  { %1412 = vmatprep.subr.mxu1 %v1487_v51 }
 0x799   :  { %1413 = vmatpush3.msra.mxu1 %v939_v57 }
 0x79a   :  { %1414 = vmatprep.subr.mxu1 %v1487_v51 }
 0x79b   :  { %1415 = vmatpush3.msra.mxu1 %v938_v61 }
 0x79c   :  { %1416 = vmatprep.subr.mxu1 %v1487_v51 }
 0x79d   :  { %1417 = vmatpush3.msra.mxu1 %v937_v14 }
 0x852   :  { %v1391_v45 = vpop.f32.mrf.mxu1 }
 0x853   :  { %v822_v46 = vadd.f32 %v1391_v45, %v1238_v44 }
 0x854   :  { %v816_v47 = vpop.f32.mrf.mxu1 }
 0x855   :  { %v817_v48 = vadd.f32 %v1238_v44, %v816_v47  ;;  %831 = vrot.lane.b32.xlu0 %v822_v46, %s1485_s29  ;;  %v826_v3 = vmax.f32 %v822_v46, 0.0 }
 0x857   :  { %829 = vrot.lane.b32.xlu1 %v817_v48, %s1485_s29  ;;  %v825_v6 = vmax.f32 %v817_v48, 0.0 }
 0x8c7   :  { %v832_v49 = vpop.permute.xlu0 %831 }
 0x8c8   :  { %1392 = vmatprep.subr.mxu0 %v832_v49  ;;  %v836_v63 = vmul.f32 %v832_v49, %v822_v46 }
 0x8c9   :  { %1393 = vmatpush3.msra.mxu0 %v832_v49  ;;  %v830_v50 = vpop.permute.xlu1 %829 }
 0x8ca   :  { %1394 = vmatprep.subr.mxu0 %v830_v50  ;;  %v835_v0 = vmul.f32 %v830_v50, %v817_v48  ;;  %v838_v4 = vmax.f32 %v836_v63, 0.0 }
 0x8cb   :  { %1395 = vmatpush3.msra.mxu0 %v830_v50 }
 0x8cc   :  { %1397 = vmatmul.mubr.msk.f32.vlgmr.msra.gmra.mxu0 %vm218_vm1, %v1560_v2  ;;  %1399 = vmatprep.subr.mxu0 %v1487_v51  ;;  %v1242_v2 = vld [vmem:[%s1690_s5 + $0x3] ss:$0 sm:$0xff]  ;;  %v837_v8 = vmax.f32 %v835_v0, 0.0 }
 0x8cd   :  { %1403 = vmatprep.mubr.msk.f32.mxu0 %vm1488_vm3, %v1487_v51 }
 0x98c   :  { %v1398_v55 = vpop.f32.mrf.mxu0 }
 0x98d   :  { %v919_v56 = vadd.f32 %v1398_v55, %v1242_v2 }
 0x98e   :  { %v913_v58 = vpop.f32.mrf.mxu0 }
 0x98f   :  { %v923_v59 = vmax.f32 %v919_v56, 0.0  ;;  %v914_v60 = vadd.f32 %v1242_v2, %v913_v58 }
 0x991   :  { %v922_v62 = vmax.f32 %v914_v60, 0.0  ;;  %928 = vrot.lane.b32.xlu0 %v923_v59, %s1486_s11 }
 0x993   :  { %926 = vrot.lane.b32.xlu1 %v922_v62, %s1486_s11 }
 0x995   :  { %1101 = vperm.xlu0 %1435, %v945_v17  }
 0xa03   :  { %v929_v5 = vpop.permute.xlu0 %928 }
 0xa04   :  { %v933_v7 = vsel %vm218_vm1, %v826_v3, %v929_v5 }
 0xa05   :  { %v927_v9 = vpop.permute.xlu1 %926  ;;  %v935_v10 = vsel %vm312_vm2, %v933_v7, %v838_v4 }
 0xa06   :  { %v932_v11 = vsel %vm218_vm1, %v825_v6, %v927_v9  ;;  %1400 = vmatpush3.msra.mxu0 %v935_v10 }
 0xa07   :  { %1401 = vmatprep.subr.mxu0 %v1487_v51  ;;  %v934_v13 = vsel %vm312_vm2, %v932_v11, %v837_v8 }
 0xa08   :  { %1402 = vmatpush3.msra.mxu0 %v934_v13 }
 0xa09   :  { %1404 = vmatmul.mubr.msk.f32.vlgmr.msra.gmra.mxu0 %vm218_vm1, %v936_v12  ;;  %1421 = vmatprep.subr.mxu0 %v1487_v51 }
 0xa0a   :  { %1423 = vmatprep.mubr.msk.f32.mxu0 %vm1488_vm3, %v1487_v51 }
 0xa10   :  { %v1102_v27 = vpop.permute.xlu0 %1101 }
 0xa11   :  { %v1107_v28 = vrot.slane %v1102_v27, %v1106_v26 }
 0xac9   :  { %v1015_v15 = vpop.f32.mrf.mxu0 }
 0xaca   :  { %1419 = vmatmul.mubr.msk.f32.vlgmr.msra.gmra.mxu1 %vm110_vm0, %v1015_v15 }
 0xacb   :  { %v1405_v16 = vpop.f32.mrf.mxu0 }
 0xb8a   :  { %v1094_v1 = vpop.f32.mrf.mxu1 }
 0xb8b   :  { %v1095_v20 = vadd.f32 %v1246_v19, %v1094_v1 }
 0xb8c   :  { %v1420_v21 = vpop.f32.mrf.mxu1 }
 0xb8d   :  { %v1098_v22 = vmax.f32 %v1095_v20, 0.0 }
 0xb8f   :  { %1422 = vmatpush3.xpose.msk.msra.mxu0 %vm312_vm2, %v1098_v22 }
 0xb92   :  { %1424 = vmatmul.mubr.msk.f32.vlgmr.msra.gmra.mxu0 %vm312_vm2, %v944_v23 }
 0xc52   :  { %v1180_v29 = vpop.f32.mrf.mxu0 }
 0xc53   :  { %v1181_v30 = vadd.f32 %v1180_v29, %v1107_v28 }
 0xc54   :  { %v1425_v31 = vpop.f32.mrf.mxu0 }
 0xc55   :  { %1185 = vst.msk [vmem:[#allocation8] sm:$0x1] %vm1184_vm4, %v1181_v30 }
 0xc56   :  { %1467 = shalt.err (!%p1464_p9)
}
 0xc57   :  { %1195 = dma.vmem_to_hbm [thread:$0]  %s1193_s15, 16, %s1695_s10, [#allocation7]  }
 0xc58   :  { %1480 = dma.done.wait [#allocation7], 16  }
 0xc59   :  { %1481 = vsyncadd [#allocation7], 4294967280 }
 0xc5a   :  { %1199 = vsyncpa [#allocation6], 1 }
 0xc5b   :  { %1200 = vsyncpa [#allocation7], 1 }
 0xc5c   :  { %1201 = vsyncmov [#allocation3] }
 0xc5f   :  { %s1202_s18 = vpop.sfrf %1201 }
 0xc60   :  { %p1250_p10 = scmp.ne.s32.totalorder %s1202_s18, 0 }
 0xc62   :  { %1206 = shalt.err (%p1250_p10)  }

</bundles_post_ra>
